<compile_context>
chip_gen: v6e
topology: v6e:2x2x1
jax: 0.10.0
libtpu: 0.0.40
codegen_flags: <defaults>
</compile_context>

<pallas_src>
import numpy as np
import jax
import jax.numpy as jnp
from jax.experimental import pallas as pl
from jax.experimental.pallas import tpu as pltpu


# ----------------------------------------------------------------------------
# Fused kernel: one batch image per grid step, activations laid out (H, W*C).
# ----------------------------------------------------------------------------
def _se_res_block_kernel(x_ref, bn1s_ref, bn1b_ref, rsh_ref, dwt_ref, bn2b_ref,
                         w1e_ref, b1_ref, w2_ref, b2_ref, scat_ref,
                         ssel_ref, wz_ref, bz_ref, wd_ref, bd_ref, out_ref):
    C = scat_ref.shape[0]
    WC = x_ref.shape[2]

    x = x_ref[0]                                           # (H, W*C) raw input
    xb = x * bn1s_ref[...] + bn1b_ref[...]                 # folded eval-mode bn1

    # Depthwise 3x3, pad=1, stride=1.  H-shift (+ zero-pad rows) via constant
    # shift matrices on the MXU; W-shift via XLU lane roll; W zero-pad edges
    # and conv1.bn2 scale are pre-folded into the (9, W*C) weight rows.
    dwt = dwt_ref[...]                                     # (9, W*C)
    acc = None
    for dh in range(3):
        xh = jnp.dot(rsh_ref[dh], xb, preferred_element_type=jnp.float32)
        for dw in range(3):
            sw = ((1 - dw) * C) % WC
            t = pltpu.roll(xh, sw, axis=1) if sw else xh
            contrib = t * dwt[dh * 3 + dw, :]
            acc = contrib if acc is None else acc + contrib

    y = jnp.maximum(acc + bn2b_ref[...], 0.0)              # bn2 shift + relu

    # Squeeze-Excitation.  avg-pool is fused into w1e (column-sum @ w1/(H*W));
    # the per-channel gate is re-tiled across W with a constant scatter matmul.
    colsum = jnp.sum(y, axis=0, keepdims=True)             # (1, W*C)
    h1 = jnp.maximum(
        jnp.dot(colsum, w1e_ref[...], preferred_element_type=jnp.float32)
        + b1_ref[...], 0.0)                                # (1, C)
    g = jax.nn.sigmoid(
        jnp.dot(h1, w2_ref[...], preferred_element_type=jnp.float32)
        + b2_ref[...])                                     # (1, C)
    g_t = jnp.dot(g, scat_ref[...], preferred_element_type=jnp.float32)  # (1, W*C)

    # conv2 (1x1, stride) + folded bn + relu, downscale (1x1, stride) + add.
    # Row subsample via constant selection matmul; the W subsample is baked
    # into the block-sparse (W*C, Wo*Cout) weights wz/wd.
    ssel = ssel_ref[...]                                   # (Ho, H)
    y_sub = jnp.dot(ssel, y, preferred_element_type=jnp.float32) * g_t   # (Ho, W*C)
    x_sub = jnp.dot(ssel, x, preferred_element_type=jnp.float32)         # (Ho, W*C)
    z = jnp.maximum(
        jnp.dot(y_sub, wz_ref[...], preferred_element_type=jnp.float32)
        + bz_ref[...], 0.0)
    d = jnp.dot(x_sub, wd_ref[...], preferred_element_type=jnp.float32) + bd_ref[...]
    out_ref[0] = z + d                                     # (Ho, Wo*Cout)


# ----------------------------------------------------------------------------
# Wrapper: NCHW in/out, constant folding of BN / padding / stride into weights.
# ----------------------------------------------------------------------------
def se_res_block(x_nchw, p, stride):
    N, C, H, W = x_nchw.shape
    Cout = p["wc"].shape[1]
    Ho, Wo = -(-H // stride), -(-W // stride)
    WC, WoCout, HW = W * C, Wo * Cout, H * W

    # NCHW -> lane-dense (N, H, W*C)
    x = jnp.transpose(x_nchw, (0, 2, 3, 1)).astype(jnp.float32).reshape(N, H, WC)

    # --- constant matrices (numpy, trace-time) ---------------------------------
    rsh = np.zeros((3, H, H), np.float32)            # H-shift with zero-pad rows
    for dh in range(3):
        for h in range(H):
            src = h + dh - 1
            if 0 <= src < H:
                rsh[dh, h, src] = 1.0
    ssel = np.zeros((Ho, H), np.float32)             # row subsample (stride)
    ssel[np.arange(Ho), np.arange(Ho) * stride] = 1.0
    scat = np.tile(np.eye(C, dtype=np.float32), (1, W))   # (C, W*C) channel->tiled

    # --- per-channel params tiled across W --------------------------------------
    tile_w = lambda v: jnp.tile(v.reshape(1, C), (1, W))        # (1, W*C)
    bn1s_t, bn1b_t = tile_w(p["c1_bn1_s"]), tile_w(p["c1_bn1_b"])
    bn2b_t = tile_w(p["c1_bn2_b"])

    # depthwise weights * bn2 scale, tiled across W; W-edge zero padding folded
    # into zeroed weight columns (dw=0 -> first C cols, dw=2 -> last C cols).
    dw_scaled = p["dw"].reshape(9, C) * p["c1_bn2_s"][None, :]
    dwt = jnp.tile(dw_scaled, (1, W))
    col_mask = np.ones((9, WC), np.float32)
    col_mask[np.array([0, 3, 6]), :C] = 0.0
    col_mask[np.array([2, 5, 8]), WC - C:] = 0.0
    dwt = dwt * col_mask

    # SE: fold the avg-pool (1/(H*W) and the sum over W) into w1.
    w1e = jnp.tile(p["w1"], (W, 1)) / float(HW)                 # (W*C, C)
    b1, w2, b2 = p["b1"].reshape(1, -1), p["w2"], p["b2"].reshape(1, -1)

    # conv2: fold bn1/bn2 into weight+bias; bake the W-stride subsample into a
    # block-sparse (W*C, Wo*Cout) weight.  Same treatment for the downscale.
    wz = (p["c2_bn1_s"][:, None] * p["wc"]) * p["c2_bn2_s"][None, :]
    bz = (p["c2_bn1_b"] @ p["wc"]) * p["c2_bn2_s"] + p["c2_bn2_b"]

    def expand_w(wmat):                                  # (C, Cout) -> (W*C, Wo*Cout)
        big = jnp.zeros((W, C, Wo, Cout), wmat.dtype)
        wo = jnp.arange(Wo)
        big = big.at[wo * stride, :, wo, :].set(wmat)
        return big.reshape(WC, WoCout)

    wzbig, wdbig = expand_w(wz), expand_w(p["wd"])
    bz_t = jnp.tile(bz.reshape(1, Cout), (1, Wo))
    bd_t = jnp.tile(p["bd"].reshape(1, Cout), (1, Wo))

    args = (x, bn1s_t, bn1b_t, jnp.asarray(rsh), dwt, bn2b_t,
            w1e, b1, w2, b2, jnp.asarray(scat),
            jnp.asarray(ssel), wzbig, bz_t, wdbig, bd_t)

    def bcast_spec(a):
        nd = a.ndim
        return pl.BlockSpec(a.shape, lambda n, _nd=nd: (0,) * _nd)

    in_specs = ([pl.BlockSpec((1, H, WC), lambda n: (n, 0, 0))]
                + [bcast_spec(a) for a in args[1:]])
    out_specs = pl.BlockSpec((1, Ho, WoCout), lambda n: (n, 0, 0))

    flops = N * (3 * 2 * H * H * WC            # H-shift matmuls
                 + 9 * 2 * H * WC              # depthwise MAC
                 + 6 * H * WC                  # bn / relu / gate
                 + 2 * WC * C + 2 * C * C + 2 * C * WC      # SE
                 + 2 * 2 * Ho * H * WC         # row-subsample matmuls
                 + 2 * 2 * Ho * WC * WoCout)   # 1x1 conv + downscale
    bytes_accessed = 4 * (int(x.size) + sum(int(a.size) for a in args[1:])
                          + N * Ho * WoCout)

    out = pl.pallas_call(
        _se_res_block_kernel,
        out_shape=jax.ShapeDtypeStruct((N, Ho, WoCout), jnp.float32),
        grid=(N,),
        in_specs=in_specs,
        out_specs=out_specs,
        compiler_params=pltpu.CompilerParams(
            dimension_semantics=("parallel",),
            vmem_limit_bytes=32 * 1024 * 1024),
        cost_estimate=pl.CostEstimate(flops=flops, transcendentals=2 * N * C,
                                      bytes_accessed=bytes_accessed),
    )(*args)

    out = out.reshape(N, Ho, Wo, Cout)
    return jnp.transpose(out, (0, 3, 1, 2))                # back to NCHW


# ----------------------------------------------------------------------------
# Deterministic parameter init (eval-mode BN folded to scale/shift)
# ----------------------------------------------------------------------------
def _fold_bn(gamma, beta, mean, var, eps=1e-5):
    scale = gamma / jnp.sqrt(var + eps)
    return scale, beta - mean * scale


def init_params(key, C, Cout):
    ks = jax.random.split(key, 16)

    def bn(k, n):
        k1, k2, k3, k4 = jax.random.split(k, 4)
        gamma = 1.0 + 0.1 * jax.random.normal(k1, (n,))
        beta = 0.1 * jax.random.normal(k2, (n,))
        mean = 0.1 * jax.random.normal(k3, (n,))
        var = 0.5 + jax.random.uniform(k4, (n,))
        return _fold_bn(gamma, beta, mean, var)

    c1b1s, c1b1b = bn(ks[0], C)
    c1b2s, c1b2b = bn(ks[1], C)
    c2b1s, c2b1b = bn(ks[2], C)
    c2b2s, c2b2b = bn(ks[3], Cout)
    p = dict(
        c1_bn1_s=c1b1s, c1_bn1_b=c1b1b, c1_bn2_s=c1b2s, c1_bn2_b=c1b2b,
        c2_bn1_s=c2b1s, c2_bn1_b=c2b1b, c2_bn2_s=c2b2s, c2_bn2_b=c2b2b,
        dw=0.2 * jax.random.normal(ks[4], (3, 3, C)),      # depthwise 3x3 (per ch)
        w1=0.3 * jax.random.normal(ks[5], (C, C)),         # SE fc1 (reduced == C)
        b1=0.1 * jax.random.normal(ks[6], (C,)),
        w2=0.3 * jax.random.normal(ks[7], (C, C)),         # SE fc2
        b2=0.1 * jax.random.normal(ks[8], (C,)),
        wc=0.3 * jax.random.normal(ks[9], (C, Cout)),      # conv2 1x1 (bias=False)
        wd=0.3 * jax.random.normal(ks[10], (C, Cout)),     # downscale 1x1
        bd=0.1 * jax.random.normal(ks[11], (Cout,)),
    )
    return {k: v.astype(jnp.float32) for k, v in p.items()}


# ----------------------------------------------------------------------------
# Pure-JAX reference (same eval-mode semantics) for validation
# ----------------------------------------------------------------------------
def ref_forward(x_nchw, p, stride):
    x = jnp.transpose(x_nchw, (0, 2, 3, 1)).astype(jnp.float32)
    N, H, W, C = x.shape
    xb = x * p["c1_bn1_s"] + p["c1_bn1_b"]
    xp = jnp.pad(xb, ((0, 0), (1, 1), (1, 1), (0, 0)))
    acc = jnp.zeros_like(x)
    for dh in range(3):
        for dw in range(3):
            acc = acc + xp[:, dh:dh + H, dw:dw + W, :] * p["dw"][dh, dw, :]
    y = jax.nn.relu(acc * p["c1_bn2_s"] + p["c1_bn2_b"])
    pooled = y.mean(axis=(1, 2))
    h = jax.nn.relu(pooled @ p["w1"] + p["b1"])
    s = jax.nn.sigmoid(h @ p["w2"] + p["b2"])
    y = y * s[:, None, None, :]
    yb = y * p["c2_bn1_s"] + p["c2_bn1_b"]
    z = jax.nn.relu((yb[:, ::stride, ::stride, :] @ p["wc"]) * p["c2_bn2_s"]
                    + p["c2_bn2_b"])
    d = x[:, ::stride, ::stride, :] @ p["wd"] + p["bd"]
    return jnp.transpose(z + d, (0, 3, 1, 2))


if __name__ == "__main__":
    # W*C = 128 and Wo*Cout = 128 -> fully lane-dense compute and stores.
    N, C, H, W = 2, 8, 16, 16
    Cout, stride = 16, 2

    key = jax.random.PRNGKey(0)
    kx, kp = jax.random.split(key)
    x = jax.random.normal(kx, (N, C, H, W), jnp.float32)       # NCHW like PyTorch
    params = init_params(kp, C, Cout)

    out = se_res_block(x, params, stride)
    out = jax.block_until_ready(out)

    assert out.shape == (N, Cout, H // stride, W // stride), out.shape
    assert bool(jnp.all(jnp.isfinite(out)))

    ref = ref_forward(x, params, stride)
    err = float(jnp.max(jnp.abs(out - ref)))
    assert err < 1e-2, f"max abs err {err}"

    print("KERNEL_OK")
</pallas_src>

<mosaic_0001>
module attributes {stable_mosaic.version = 11 : i64} {
  func.func @_se_res_block_kernel(%arg0: i32, %arg1: memref<1x16x128xf32, #tpu.memory_space<vmem>>, %arg2: memref<1x128xf32, #tpu.memory_space<vmem>>, %arg3: memref<1x128xf32, #tpu.memory_space<vmem>>, %arg4: memref<3x16x16xf32, #tpu.memory_space<vmem>>, %arg5: memref<9x128xf32, #tpu.memory_space<vmem>>, %arg6: memref<1x128xf32, #tpu.memory_space<vmem>>, %arg7: memref<128x8xf32, #tpu.memory_space<vmem>>, %arg8: memref<1x8xf32, #tpu.memory_space<vmem>>, %arg9: memref<8x8xf32, #tpu.memory_space<vmem>>, %arg10: memref<1x8xf32, #tpu.memory_space<vmem>>, %arg11: memref<8x128xf32, #tpu.memory_space<vmem>>, %arg12: memref<8x16xf32, #tpu.memory_space<vmem>>, %arg13: memref<128x128xf32, #tpu.memory_space<vmem>>, %arg14: memref<1x128xf32, #tpu.memory_space<vmem>>, %arg15: memref<128x128xf32, #tpu.memory_space<vmem>>, %arg16: memref<1x128xf32, #tpu.memory_space<vmem>>, %arg17: memref<1x8x128xf32, #tpu.memory_space<vmem>>) attributes {dimension_semantics = [#tpu.dimension_semantics<parallel>], iteration_bounds = array<i64: 2>, scalar_prefetch = 0 : i64, scratch_operands = 0 : i64, tpu.core_type = #tpu.core_type<tc>, window_params = [{transform_indices = @transform_0, window_bounds = array<i64: 1, 16, 128>}, {pipeline_mode = #tpu.pipeline_mode<synchronous>, transform_indices = @transform_1, window_bounds = array<i64: 1, 128>}, {pipeline_mode = #tpu.pipeline_mode<synchronous>, transform_indices = @transform_2, window_bounds = array<i64: 1, 128>}, {pipeline_mode = #tpu.pipeline_mode<synchronous>, transform_indices = @transform_3, window_bounds = array<i64: 3, 16, 16>}, {pipeline_mode = #tpu.pipeline_mode<synchronous>, transform_indices = @transform_4, window_bounds = array<i64: 9, 128>}, {pipeline_mode = #tpu.pipeline_mode<synchronous>, transform_indices = @transform_5, window_bounds = array<i64: 1, 128>}, {pipeline_mode = #tpu.pipeline_mode<synchronous>, transform_indices = @transform_6, window_bounds = array<i64: 128, 8>}, {pipeline_mode = #tpu.pipeline_mode<synchronous>, transform_indices = @transform_7, window_bounds = array<i64: 1, 8>}, {pipeline_mode = #tpu.pipeline_mode<synchronous>, transform_indices = @transform_8, window_bounds = array<i64: 8, 8>}, {pipeline_mode = #tpu.pipeline_mode<synchronous>, transform_indices = @transform_9, window_bounds = array<i64: 1, 8>}, {pipeline_mode = #tpu.pipeline_mode<synchronous>, transform_indices = @transform_10, window_bounds = array<i64: 8, 128>}, {pipeline_mode = #tpu.pipeline_mode<synchronous>, transform_indices = @transform_11, window_bounds = array<i64: 8, 16>}, {pipeline_mode = #tpu.pipeline_mode<synchronous>, transform_indices = @transform_12, window_bounds = array<i64: 128, 128>}, {pipeline_mode = #tpu.pipeline_mode<synchronous>, transform_indices = @transform_13, window_bounds = array<i64: 1, 128>}, {pipeline_mode = #tpu.pipeline_mode<synchronous>, transform_indices = @transform_14, window_bounds = array<i64: 128, 128>}, {pipeline_mode = #tpu.pipeline_mode<synchronous>, transform_indices = @transform_15, window_bounds = array<i64: 1, 128>}, {transform_indices = @transform_16, window_bounds = array<i64: 1, 8, 128>}]} {
    %c0 = arith.constant 0 : index
    %c0_0 = arith.constant 0 : index
    %c0_1 = arith.constant 0 : index
    %0 = vector.load %arg1[%c0, %c0_0, %c0_1] : memref<1x16x128xf32, #tpu.memory_space<vmem>>, vector<1x16x128xf32>
    %1 = vector.shape_cast %0 : vector<1x16x128xf32> to vector<16x128xf32>
    %c0_2 = arith.constant 0 : index
    %c0_3 = arith.constant 0 : index
    %2 = vector.load %arg2[%c0_2, %c0_3] : memref<1x128xf32, #tpu.memory_space<vmem>>, vector<1x128xf32>
    %3 = vector.broadcast %2 : vector<1x128xf32> to vector<16x128xf32>
    %4 = arith.mulf %1, %3 : vector<16x128xf32>
    %c0_4 = arith.constant 0 : index
    %c0_5 = arith.constant 0 : index
    %5 = vector.load %arg3[%c0_4, %c0_5] : memref<1x128xf32, #tpu.memory_space<vmem>>, vector<1x128xf32>
    %6 = vector.broadcast %5 : vector<1x128xf32> to vector<16x128xf32>
    %7 = arith.addf %4, %6 : vector<16x128xf32>
    %c0_6 = arith.constant 0 : index
    %c0_7 = arith.constant 0 : index
    %8 = vector.load %arg5[%c0_6, %c0_7] : memref<9x128xf32, #tpu.memory_space<vmem>>, vector<9x128xf32>
    %c0_8 = arith.constant 0 : index
    %c0_9 = arith.constant 0 : index
    %c0_10 = arith.constant 0 : index
    %9 = vector.load %arg4[%c0_8, %c0_9, %c0_10] : memref<3x16x16xf32, #tpu.memory_space<vmem>>, vector<1x16x16xf32>
    %10 = vector.shape_cast %9 : vector<1x16x16xf32> to vector<16x16xf32>
    %cst = arith.constant dense<0.000000e+00> : vector<16x128xf32>
    %11 = tpu.matmul %10, %7, %cst {dimension_numbers = #tpu.dot_dimension_numbers<[1], [0], [0], [1], [0, 0, 1, 1], [], []>} : vector<16x16xf32>, vector<16x128xf32>, vector<16x128xf32> -> vector<16x128xf32>
    %c8_i32 = arith.constant 8 : i32
    %12 = tpu.dynamic_rotate %11 by %c8_i32 dim 1 : vector<16x128xf32>, i32 -> vector<16x128xf32>
    %13 = vector.extract_strided_slice %8 {offsets = [0, 0], sizes = [1, 128], strides = [1, 1]} : vector<9x128xf32> to vector<1x128xf32>
    %14 = vector.shape_cast %13 : vector<1x128xf32> to vector<128xf32>
    %15 = vector.shape_cast %14 : vector<128xf32> to vector<1x128xf32>
    %16 = vector.broadcast %15 : vector<1x128xf32> to vector<16x128xf32>
    %17 = arith.mulf %12, %16 : vector<16x128xf32>
    %18 = vector.extract_strided_slice %8 {offsets = [1, 0], sizes = [1, 128], strides = [1, 1]} : vector<9x128xf32> to vector<1x128xf32>
    %19 = vector.shape_cast %18 : vector<1x128xf32> to vector<128xf32>
    %20 = vector.shape_cast %19 : vector<128xf32> to vector<1x128xf32>
    %21 = vector.broadcast %20 : vector<1x128xf32> to vector<16x128xf32>
    %22 = arith.mulf %11, %21 : vector<16x128xf32>
    %23 = arith.addf %17, %22 : vector<16x128xf32>
    %c120_i32 = arith.constant 120 : i32
    %24 = tpu.dynamic_rotate %11 by %c120_i32 dim 1 : vector<16x128xf32>, i32 -> vector<16x128xf32>
    %25 = vector.extract_strided_slice %8 {offsets = [2, 0], sizes = [1, 128], strides = [1, 1]} : vector<9x128xf32> to vector<1x128xf32>
    %26 = vector.shape_cast %25 : vector<1x128xf32> to vector<128xf32>
    %27 = vector.shape_cast %26 : vector<128xf32> to vector<1x128xf32>
    %28 = vector.broadcast %27 : vector<1x128xf32> to vector<16x128xf32>
    %29 = arith.mulf %24, %28 : vector<16x128xf32>
    %30 = arith.addf %23, %29 : vector<16x128xf32>
    %c1 = arith.constant 1 : index
    %c0_11 = arith.constant 0 : index
    %c0_12 = arith.constant 0 : index
    %31 = vector.load %arg4[%c1, %c0_11, %c0_12] : memref<3x16x16xf32, #tpu.memory_space<vmem>>, vector<1x16x16xf32>
    %32 = vector.shape_cast %31 : vector<1x16x16xf32> to vector<16x16xf32>
    %cst_13 = arith.constant dense<0.000000e+00> : vector<16x128xf32>
    %33 = tpu.matmul %32, %7, %cst_13 {dimension_numbers = #tpu.dot_dimension_numbers<[1], [0], [0], [1], [0, 0, 1, 1], [], []>} : vector<16x16xf32>, vector<16x128xf32>, vector<16x128xf32> -> vector<16x128xf32>
    %c8_i32_14 = arith.constant 8 : i32
    %34 = tpu.dynamic_rotate %33 by %c8_i32_14 dim 1 : vector<16x128xf32>, i32 -> vector<16x128xf32>
    %35 = vector.extract_strided_slice %8 {offsets = [3, 0], sizes = [1, 128], strides = [1, 1]} : vector<9x128xf32> to vector<1x128xf32>
    %36 = vector.shape_cast %35 : vector<1x128xf32> to vector<128xf32>
    %37 = vector.shape_cast %36 : vector<128xf32> to vector<1x128xf32>
    %38 = vector.broadcast %37 : vector<1x128xf32> to vector<16x128xf32>
    %39 = arith.mulf %34, %38 : vector<16x128xf32>
    %40 = arith.addf %30, %39 : vector<16x128xf32>
    %41 = vector.extract_strided_slice %8 {offsets = [4, 0], sizes = [1, 128], strides = [1, 1]} : vector<9x128xf32> to vector<1x128xf32>
    %42 = vector.shape_cast %41 : vector<1x128xf32> to vector<128xf32>
    %43 = vector.shape_cast %42 : vector<128xf32> to vector<1x128xf32>
    %44 = vector.broadcast %43 : vector<1x128xf32> to vector<16x128xf32>
    %45 = arith.mulf %33, %44 : vector<16x128xf32>
    %46 = arith.addf %40, %45 : vector<16x128xf32>
    %c120_i32_15 = arith.constant 120 : i32
    %47 = tpu.dynamic_rotate %33 by %c120_i32_15 dim 1 : vector<16x128xf32>, i32 -> vector<16x128xf32>
    %48 = vector.extract_strided_slice %8 {offsets = [5, 0], sizes = [1, 128], strides = [1, 1]} : vector<9x128xf32> to vector<1x128xf32>
    %49 = vector.shape_cast %48 : vector<1x128xf32> to vector<128xf32>
    %50 = vector.shape_cast %49 : vector<128xf32> to vector<1x128xf32>
    %51 = vector.broadcast %50 : vector<1x128xf32> to vector<16x128xf32>
    %52 = arith.mulf %47, %51 : vector<16x128xf32>
    %53 = arith.addf %46, %52 : vector<16x128xf32>
    %c2 = arith.constant 2 : index
    %c0_16 = arith.constant 0 : index
    %c0_17 = arith.constant 0 : index
    %54 = vector.load %arg4[%c2, %c0_16, %c0_17] : memref<3x16x16xf32, #tpu.memory_space<vmem>>, vector<1x16x16xf32>
    %55 = vector.shape_cast %54 : vector<1x16x16xf32> to vector<16x16xf32>
    %cst_18 = arith.constant dense<0.000000e+00> : vector<16x128xf32>
    %56 = tpu.matmul %55, %7, %cst_18 {dimension_numbers = #tpu.dot_dimension_numbers<[1], [0], [0], [1], [0, 0, 1, 1], [], []>} : vector<16x16xf32>, vector<16x128xf32>, vector<16x128xf32> -> vector<16x128xf32>
    %c8_i32_19 = arith.constant 8 : i32
    %57 = tpu.dynamic_rotate %56 by %c8_i32_19 dim 1 : vector<16x128xf32>, i32 -> vector<16x128xf32>
    %58 = vector.extract_strided_slice %8 {offsets = [6, 0], sizes = [1, 128], strides = [1, 1]} : vector<9x128xf32> to vector<1x128xf32>
    %59 = vector.shape_cast %58 : vector<1x128xf32> to vector<128xf32>
    %60 = vector.shape_cast %59 : vector<128xf32> to vector<1x128xf32>
    %61 = vector.broadcast %60 : vector<1x128xf32> to vector<16x128xf32>
    %62 = arith.mulf %57, %61 : vector<16x128xf32>
    %63 = arith.addf %53, %62 : vector<16x128xf32>
    %64 = vector.extract_strided_slice %8 {offsets = [7, 0], sizes = [1, 128], strides = [1, 1]} : vector<9x128xf32> to vector<1x128xf32>
    %65 = vector.shape_cast %64 : vector<1x128xf32> to vector<128xf32>
    %66 = vector.shape_cast %65 : vector<128xf32> to vector<1x128xf32>
    %67 = vector.broadcast %66 : vector<1x128xf32> to vector<16x128xf32>
    %68 = arith.mulf %56, %67 : vector<16x128xf32>
    %69 = arith.addf %63, %68 : vector<16x128xf32>
    %c120_i32_20 = arith.constant 120 : i32
    %70 = tpu.dynamic_rotate %56 by %c120_i32_20 dim 1 : vector<16x128xf32>, i32 -> vector<16x128xf32>
    %71 = vector.extract_strided_slice %8 {offsets = [8, 0], sizes = [1, 128], strides = [1, 1]} : vector<9x128xf32> to vector<1x128xf32>
    %72 = vector.shape_cast %71 : vector<1x128xf32> to vector<128xf32>
    %73 = vector.shape_cast %72 : vector<128xf32> to vector<1x128xf32>
    %74 = vector.broadcast %73 : vector<1x128xf32> to vector<16x128xf32>
    %75 = arith.mulf %70, %74 : vector<16x128xf32>
    %76 = arith.addf %69, %75 : vector<16x128xf32>
    %c0_21 = arith.constant 0 : index
    %c0_22 = arith.constant 0 : index
    %77 = vector.load %arg6[%c0_21, %c0_22] : memref<1x128xf32, #tpu.memory_space<vmem>>, vector<1x128xf32>
    %78 = vector.broadcast %77 : vector<1x128xf32> to vector<16x128xf32>
    %79 = arith.addf %76, %78 : vector<16x128xf32>
    %cst_23 = arith.constant 0.000000e+00 : f32
    %80 = vector.broadcast %cst_23 : f32 to vector<16x128xf32>
    %81 = arith.maximumf %79, %80 : vector<16x128xf32>
    %cst_24 = arith.constant dense<0.000000e+00> : vector<128xf32>
    %82 = vector.multi_reduction <add>, %81, %cst_24 [0] : vector<16x128xf32> to vector<128xf32>
    %83 = vector.shape_cast %82 : vector<128xf32> to vector<1x128xf32>
    %c0_25 = arith.constant 0 : index
    %c0_26 = arith.constant 0 : index
    %84 = vector.load %arg7[%c0_25, %c0_26] : memref<128x8xf32, #tpu.memory_space<vmem>>, vector<128x8xf32>
    %cst_27 = arith.constant dense<0.000000e+00> : vector<1x8xf32>
    %85 = tpu.matmul %83, %84, %cst_27 {dimension_numbers = #tpu.dot_dimension_numbers<[1], [0], [0], [1], [0, 0, 1, 1], [], []>} : vector<1x128xf32>, vector<128x8xf32>, vector<1x8xf32> -> vector<1x8xf32>
    %c0_28 = arith.constant 0 : index
    %c0_29 = arith.constant 0 : index
    %86 = vector.load %arg8[%c0_28, %c0_29] : memref<1x8xf32, #tpu.memory_space<vmem>>, vector<1x8xf32>
    %87 = arith.addf %85, %86 : vector<1x8xf32>
    %cst_30 = arith.constant 0.000000e+00 : f32
    %88 = vector.broadcast %cst_30 : f32 to vector<1x8xf32>
    %89 = arith.maximumf %87, %88 : vector<1x8xf32>
    %c0_31 = arith.constant 0 : index
    %c0_32 = arith.constant 0 : index
    %90 = vector.load %arg9[%c0_31, %c0_32] : memref<8x8xf32, #tpu.memory_space<vmem>>, vector<8x8xf32>
    %cst_33 = arith.constant dense<0.000000e+00> : vector<1x8xf32>
    %91 = tpu.matmul %89, %90, %cst_33 {dimension_numbers = #tpu.dot_dimension_numbers<[1], [0], [0], [1], [0, 0, 1, 1], [], []>} : vector<1x8xf32>, vector<8x8xf32>, vector<1x8xf32> -> vector<1x8xf32>
    %c0_34 = arith.constant 0 : index
    %c0_35 = arith.constant 0 : index
    %92 = vector.load %arg10[%c0_34, %c0_35] : memref<1x8xf32, #tpu.memory_space<vmem>>, vector<1x8xf32>
    %93 = arith.addf %91, %92 : vector<1x8xf32>
    %94 = arith.negf %93 : vector<1x8xf32>
    %95 = math.exp %94 : vector<1x8xf32>
    %cst_36 = arith.constant 1.000000e+00 : f32
    %96 = vector.broadcast %cst_36 : f32 to vector<1x8xf32>
    %97 = arith.addf %96, %95 : vector<1x8xf32>
    %98 = arith.divf %96, %97 : vector<1x8xf32>
    %c0_37 = arith.constant 0 : index
    %c0_38 = arith.constant 0 : index
    %99 = vector.load %arg11[%c0_37, %c0_38] : memref<8x128xf32, #tpu.memory_space<vmem>>, vector<8x128xf32>
    %cst_39 = arith.constant dense<0.000000e+00> : vector<1x128xf32>
    %100 = tpu.matmul %98, %99, %cst_39 {dimension_numbers = #tpu.dot_dimension_numbers<[1], [0], [0], [1], [0, 0, 1, 1], [], []>} : vector<1x8xf32>, vector<8x128xf32>, vector<1x128xf32> -> vector<1x128xf32>
    %c0_40 = arith.constant 0 : index
    %c0_41 = arith.constant 0 : index
    %101 = vector.load %arg12[%c0_40, %c0_41] : memref<8x16xf32, #tpu.memory_space<vmem>>, vector<8x16xf32>
    %cst_42 = arith.constant dense<0.000000e+00> : vector<8x128xf32>
    %102 = tpu.matmul %101, %81, %cst_42 {dimension_numbers = #tpu.dot_dimension_numbers<[1], [0], [0], [1], [0, 0, 1, 1], [], []>} : vector<8x16xf32>, vector<16x128xf32>, vector<8x128xf32> -> vector<8x128xf32>
    %103 = vector.broadcast %100 : vector<1x128xf32> to vector<8x128xf32>
    %104 = arith.mulf %102, %103 : vector<8x128xf32>
    %cst_43 = arith.constant dense<0.000000e+00> : vector<8x128xf32>
    %105 = tpu.matmul %101, %1, %cst_43 {dimension_numbers = #tpu.dot_dimension_numbers<[1], [0], [0], [1], [0, 0, 1, 1], [], []>} : vector<8x16xf32>, vector<16x128xf32>, vector<8x128xf32> -> vector<8x128xf32>
    %c0_44 = arith.constant 0 : index
    %c0_45 = arith.constant 0 : index
    %106 = vector.load %arg13[%c0_44, %c0_45] : memref<128x128xf32, #tpu.memory_space<vmem>>, vector<128x128xf32>
    %cst_46 = arith.constant dense<0.000000e+00> : vector<8x128xf32>
    %107 = tpu.matmul %104, %106, %cst_46 {dimension_numbers = #tpu.dot_dimension_numbers<[1], [0], [0], [1], [0, 0, 1, 1], [], []>} : vector<8x128xf32>, vector<128x128xf32>, vector<8x128xf32> -> vector<8x128xf32>
    %c0_47 = arith.constant 0 : index
    %c0_48 = arith.constant 0 : index
    %108 = vector.load %arg14[%c0_47, %c0_48] : memref<1x128xf32, #tpu.memory_space<vmem>>, vector<1x128xf32>
    %109 = vector.broadcast %108 : vector<1x128xf32> to vector<8x128xf32>
    %110 = arith.addf %107, %109 : vector<8x128xf32>
    %cst_49 = arith.constant 0.000000e+00 : f32
    %111 = vector.broadcast %cst_49 : f32 to vector<8x128xf32>
    %112 = arith.maximumf %110, %111 : vector<8x128xf32>
    %c0_50 = arith.constant 0 : index
    %c0_51 = arith.constant 0 : index
    %113 = vector.load %arg15[%c0_50, %c0_51] : memref<128x128xf32, #tpu.memory_space<vmem>>, vector<128x128xf32>
    %cst_52 = arith.constant dense<0.000000e+00> : vector<8x128xf32>
    %114 = tpu.matmul %105, %113, %cst_52 {dimension_numbers = #tpu.dot_dimension_numbers<[1], [0], [0], [1], [0, 0, 1, 1], [], []>} : vector<8x128xf32>, vector<128x128xf32>, vector<8x128xf32> -> vector<8x128xf32>
    %c0_53 = arith.constant 0 : index
    %c0_54 = arith.constant 0 : index
    %115 = vector.load %arg16[%c0_53, %c0_54] : memref<1x128xf32, #tpu.memory_space<vmem>>, vector<1x128xf32>
    %116 = vector.broadcast %115 : vector<1x128xf32> to vector<8x128xf32>
    %117 = arith.addf %114, %116 : vector<8x128xf32>
    %118 = arith.addf %112, %117 : vector<8x128xf32>
    %c0_55 = arith.constant 0 : index
    %c0_56 = arith.constant 0 : index
    %c0_57 = arith.constant 0 : index
    %119 = vector.load %arg17[%c0_55, %c0_56, %c0_57] : memref<1x8x128xf32, #tpu.memory_space<vmem>>, vector<1x8x128xf32>
    %120 = vector.shape_cast %119 : vector<1x8x128xf32> to vector<8x128xf32>
    %121 = vector.shape_cast %118 : vector<8x128xf32> to vector<1x8x128xf32>
    tpu.vector_store %arg17[%c0_55, %c0_56, %c0_57], %121 {strides = array<i32>} : memref<1x8x128xf32, #tpu.memory_space<vmem>>, vector<1x8x128xf32>,
    return
  }
  func.func @transform_0(%arg0: i32) -> (i32, i32, i32) {
    %c0_i32 = arith.constant 0 : i32
    %c0_i32_0 = arith.constant 0 : i32
    %c0_i32_1 = arith.constant 0 : i32
    return %arg0, %c0_i32, %c0_i32_0 : i32, i32, i32
  }
  func.func @transform_1(%arg0: i32) -> (i32, i32) {
    %c0_i32 = arith.constant 0 : i32
    %c0_i32_0 = arith.constant 0 : i32
    %c0_i32_1 = arith.constant 0 : i32
    return %c0_i32, %c0_i32_0 : i32, i32
  }
  func.func @transform_2(%arg0: i32) -> (i32, i32) {
    %c0_i32 = arith.constant 0 : i32
    %c0_i32_0 = arith.constant 0 : i32
    %c0_i32_1 = arith.constant 0 : i32
    return %c0_i32, %c0_i32_0 : i32, i32
  }
  func.func @transform_3(%arg0: i32) -> (i32, i32, i32) {
    %c0_i32 = arith.constant 0 : i32
    %c0_i32_0 = arith.constant 0 : i32
    %c0_i32_1 = arith.constant 0 : i32
    %c0_i32_2 = arith.constant 0 : i32
    return %c0_i32, %c0_i32_0, %c0_i32_1 : i32, i32, i32
  }
  func.func @transform_4(%arg0: i32) -> (i32, i32) {
    %c0_i32 = arith.constant 0 : i32
    %c0_i32_0 = arith.constant 0 : i32
    %c0_i32_1 = arith.constant 0 : i32
    return %c0_i32, %c0_i32_0 : i32, i32
  }
  func.func @transform_5(%arg0: i32) -> (i32, i32) {
    %c0_i32 = arith.constant 0 : i32
    %c0_i32_0 = arith.constant 0 : i32
    %c0_i32_1 = arith.constant 0 : i32
    return %c0_i32, %c0_i32_0 : i32, i32
  }
  func.func @transform_6(%arg0: i32) -> (i32, i32) {
    %c0_i32 = arith.constant 0 : i32
    %c0_i32_0 = arith.constant 0 : i32
    %c0_i32_1 = arith.constant 0 : i32
    return %c0_i32, %c0_i32_0 : i32, i32
  }
  func.func @transform_7(%arg0: i32) -> (i32, i32) {
    %c0_i32 = arith.constant 0 : i32
    %c0_i32_0 = arith.constant 0 : i32
    %c0_i32_1 = arith.constant 0 : i32
    return %c0_i32, %c0_i32_0 : i32, i32
  }
  func.func @transform_8(%arg0: i32) -> (i32, i32) {
    %c0_i32 = arith.constant 0 : i32
    %c0_i32_0 = arith.constant 0 : i32
    %c0_i32_1 = arith.constant 0 : i32
    return %c0_i32, %c0_i32_0 : i32, i32
  }
  func.func @transform_9(%arg0: i32) -> (i32, i32) {
    %c0_i32 = arith.constant 0 : i32
    %c0_i32_0 = arith.constant 0 : i32
    %c0_i32_1 = arith.constant 0 : i32
    return %c0_i32, %c0_i32_0 : i32, i32
  }
  func.func @transform_10(%arg0: i32) -> (i32, i32) {
    %c0_i32 = arith.constant 0 : i32
    %c0_i32_0 = arith.constant 0 : i32
    %c0_i32_1 = arith.constant 0 : i32
    return %c0_i32, %c0_i32_0 : i32, i32
  }
  func.func @transform_11(%arg0: i32) -> (i32, i32) {
    %c0_i32 = arith.constant 0 : i32
    %c0_i32_0 = arith.constant 0 : i32
    %c0_i32_1 = arith.constant 0 : i32
    return %c0_i32, %c0_i32_0 : i32, i32
  }
  func.func @transform_12(%arg0: i32) -> (i32, i32) {
    %c0_i32 = arith.constant 0 : i32
    %c0_i32_0 = arith.constant 0 : i32
    %c0_i32_1 = arith.constant 0 : i32
    return %c0_i32, %c0_i32_0 : i32, i32
  }
  func.func @transform_13(%arg0: i32) -> (i32, i32) {
    %c0_i32 = arith.constant 0 : i32
    %c0_i32_0 = arith.constant 0 : i32
    %c0_i32_1 = arith.constant 0 : i32
    return %c0_i32, %c0_i32_0 : i32, i32
  }
  func.func @transform_14(%arg0: i32) -> (i32, i32) {
    %c0_i32 = arith.constant 0 : i32
    %c0_i32_0 = arith.constant 0 : i32
    %c0_i32_1 = arith.constant 0 : i32
    return %c0_i32, %c0_i32_0 : i32, i32
  }
  func.func @transform_15(%arg0: i32) -> (i32, i32) {
    %c0_i32 = arith.constant 0 : i32
    %c0_i32_0 = arith.constant 0 : i32
    %c0_i32_1 = arith.constant 0 : i32
    return %c0_i32, %c0_i32_0 : i32, i32
  }
  func.func @transform_16(%arg0: i32) -> (i32, i32, i32) {
    %c0_i32 = arith.constant 0 : i32
    %c0_i32_0 = arith.constant 0 : i32
    %c0_i32_1 = arith.constant 0 : i32
    return %arg0, %c0_i32, %c0_i32_0 : i32, i32, i32
  }
}

</mosaic_0001>

<bundles_post_ra>
// kernel: tpu_custom_call.1
= control target key start
LH: loop header
LB: loop body
LE: loop exit
PB: predicated region body
PF: predicated region fallthrough
CT: control target
= control target key end

     0   :  { %s2832_s0 = inlined_call_operand.hbm [shape: f32[2,16,128], index: 0, kind: input, shape index: {}]   ;;  %s2833_s1 = inlined_call_operand.vmem [shape: f32[1,128], index: 1, kind: input, shape index: {}]   ;;  %s2834_s2 = inlined_call_operand.vmem [shape: f32[1,128], index: 2, kind: input, shape index: {}]   ;;  %s2835_s3 = inlined_call_operand.hbm [shape: f32[3,16,16], index: 3, kind: input, shape index: {}]   ;;  %s2836_s4 = inlined_call_operand.vmem [shape: f32[9,128], index: 4, kind: input, shape index: {}]   ;;  %s2837_s5 = inlined_call_operand.vmem [shape: f32[1,128], index: 5, kind: input, shape index: {}]   ;;  %s2838_s6 = inlined_call_operand.vmem [shape: f32[128,8], index: 6, kind: input, shape index: {}]   ;;  %s2839_s7 = inlined_call_operand.vmem [shape: f32[1,8], index: 7, kind: input, shape index: {}]   ;;  %s2840_s8 = inlined_call_operand.vmem [shape: f32[8,8], index: 8, kind: input, shape index: {}]   ;;  %s2841_s9 = inlined_call_operand.vmem [shape: f32[1,8], index: 9, kind: input, shape index: {}]   ;;  %s2842_s10 = inlined_call_operand.hbm [shape: f32[8,128], index: 10, kind: input, shape index: {}]   ;;  %s2843_s11 = inlined_call_operand.hbm [shape: f32[8,16], index: 11, kind: input, shape index: {}]   ;;  %s2844_s12 = inlined_call_operand.vmem [shape: f32[128,128], index: 12, kind: input, shape index: {}]   ;;  %s2845_s13 = inlined_call_operand.vmem [shape: f32[1,128], index: 13, kind: input, shape index: {}]   ;;  %s2846_s14 = inlined_call_operand.hbm [shape: f32[128,128], index: 14, kind: input, shape index: {}]   ;;  %s2847_s15 = inlined_call_operand.vmem [shape: f32[1,128], index: 15, kind: input, shape index: {}]   ;;  %s2848_s16 = inlined_call_operand.hbm [shape: f32[2,8,128], index: 16, kind: output, shape index: {}]  }
   0x1   :  { %2860 = sst [smem:[#allocation20_spill]] %s2832_s0 }
   0x2   :  { %2861 = sst [smem:[#allocation21_spill]] %s2835_s3 }
   0x3   :  { %2862 = sst [smem:[#allocation22_spill]] %s2842_s10 }
   0x4   :  { %2863 = sst [smem:[#allocation23_spill]] %s2843_s11 }
   0x5   :  { %2864 = sst [smem:[#allocation24_spill]] %s2846_s14 }
   0x6   :  { %2865 = sst [smem:[#allocation25_spill]] %s2847_s15 }
   0x7   :  { %2866 = sst [smem:[#allocation26_spill]] %s2848_s16 }
   0x8   :  { %21 = vsyncpa [#allocation3], 0 }
   0x9   :  { %23 = vsyncpa [#allocation3 + $0x1], 0 }
   0xa   :  { %24 = vsyncpa [#allocation6], 0 }
   0xb   :  { %25 = vsyncpa [#allocation9], 0 }
   0xc   :  { %26 = vsyncpa [#allocation4], 0 }
   0xd   :  { %28 = vsyncpa [#allocation4 + $0x1], 0  ;;  %s2346_s21 = smov 0   ;;  %s2348_s22 = smov 0  }
   0xe   :  { %s2350_s23 = smov 0   ;;  %s2352_s24 = smov 0  }
   0xf LB: > { %2867 = sst [smem:[#allocation16_spill]] %s2235_s21  ;;  %s2367_s25 = sadd.s32 4294967295, %s2247_s24   ;;  %s2247_s24 = sphi %s2352_s24, %s2904_s24   ;;  %s2243_s23 = sphi %s2350_s23, %s2900_s23   ;;  %s2239_s22 = sphi %s2348_s22, %s2903_s22   ;;  %s2235_s21 = sphi %s2346_s21, %s2902_s21  }
  0x10   : > { %2868 = sst [smem:[#allocation17_spill]] %s2243_s23  ;;  %s1684_s26 = sadd.s32 4294967294, %s2247_s24  }
  0x11   : > { %p54_p0 = scmp.ne.s32.totalorder %s2239_s22, %s2235_s21  ;;  %p2853_p1 = scmp.eq.s32.totalorder %s2367_s25, 0 }
  0x12   : > { %p399_p3 = scmp.eq.s32.totalorder %s1684_s26, 1  ;;  %p1685_p5 = scmp.ge.s32.totalorder %s2247_s24, 1 }
  0x13   : > { %p2376_p4 = por %p2853_p1, %p54_p0  ;;  %p406_p7 = scmp.lt.s32.totalorder %s2247_s24, 3 }
  0x14   : > { %p2381_p6 = por %p399_p3, %p54_p0  ;;  %s2249_s30 = smov [#allocation5]  }
  0x15   : > { %s2869_s27 = scalar_select %p2376_p4, 1, 0 }
  0x16   : > { %s2870_s28 = scalar_select %p2381_p6, 1, 0 }
  0x17   : > { %p2386_p8 = pnand %p1685_p5, %p406_p7  ;;  %s424_s0 = sshll.u32 %s2249_s30, 4  ;;  %s425_s0 = int_to_ptr.vmem [resolvable:$true] %s424_s0 }
  0x18   : > { %2871 = sst [smem:[#allocation18_spill]] %s2870_s28  ;;  %s2250_s18 = smov [#allocation8]  }
  0x19   : > { %s2872_s29 = scalar_select %p2386_p8, 1, 0 }
  0x1a   : > { %p1966_p9 = pneg %p2386_p8  ;;  %s467_s19 = sshll.u32 %s2250_s18, 4  ;;  %s468_s19 = int_to_ptr.vmem [resolvable:$true] %s467_s19 }
  0x1b   : > { %s2251_s20 = smov [#allocation7]   ;;  %s2054_s28 = scalar_lea.vmem %s425_s0, 768 }
  0x1c   : > { %p2395_p11 = pnand %p1966_p9, %p2853_p1  ;;  %s456_s26 = sshll.u32 %s2251_s20, 4  ;;  %s457_s26 = int_to_ptr.vmem [resolvable:$true] %s456_s26 }
  0x1d   : > { %p2055_p13 = scmp.ne.s32.totalorder %s425_s0, %s2054_s28  ;;  %p2062_p5 = scmp.lt.s32.totalorder %s425_s0, %s425_s0 }
  0x1e   : > { %p2045_p12 = pneg %p2395_p11  ;;  %p2063_p7 = scmp.lt.s32.totalorder %s2054_s28, %s2054_s28 }
  0x20   : > { %p2057_p0 = pnand %p2055_p13, %p2045_p12  ;;  %p2064_p9 = por %p2063_p7, %p2062_p5 }
  0x22   : > { %p2058_p3 = pneg %p2057_p0 }
  0x24   : > { %p2065_p10 = pnand %p2064_p9, %p2058_p3 }
  0x26   : > { %2068 = shalt.err (!%p2065_p10)
}
  0x27   : > { %s2855_s30 = smov 128   ;;  %s2856_s18 = smov 8  }
  0x28   : > { %s2874_s3 = sld [smem:[#allocation21_spill]]  ;;  %s2080_s16 = scalar_lea.vmem %s468_s19, 128 }
  0x29   : > { %p2081_p13 = scmp.ne.s32.totalorder %s468_s19, %s2080_s16  ;;  %p2088_p3 = scmp.lt.s32.totalorder %s468_s19, %s468_s19 }
  0x2a   : > { %p2089_p10 = scmp.lt.s32.totalorder %s2080_s16, %s2080_s16 }
  0x2b   : > { %p2083_p0 = pnand %p2081_p13, %p2045_p12 }
  0x2c   : > { %p2090_p7 = por %p2089_p10, %p2088_p3 }
  0x2d   : > { %p2084_p5 = pneg %p2083_p0 }
  0x2e   : > { %1969 = dma.hbm_to_vmem [thread:$0]  (!%p2395_p11), %s2874_s3, 768, %s425_s0, [#allocation6], %s2855_s30, %s2855_s30, %s2856_s18  }
  0x2f   : > { %p2091_p9 = pnand %p2090_p7, %p2084_p5 }
  0x31   : > { %2094 = shalt.err (!%p2091_p9)
}
  0x32   : > { %s2875_s11 = sld [smem:[#allocation23_spill]]  ;;  %s2106_s21 = scalar_lea.vmem %s457_s26, 128 }
  0x33   : > { %p2107_p1 = scmp.ne.s32.totalorder %s457_s26, %s2106_s21  ;;  %p2114_p0 = scmp.lt.s32.totalorder %s457_s26, %s457_s26 }
  0x34   : > { %p2115_p6 = scmp.lt.s32.totalorder %s2106_s21, %s2106_s21 }
  0x35   : > { %p2109_p2 = pnand %p2107_p1, %p2045_p12 }
  0x36   : > { %p2116_p4 = por %p2115_p6, %p2114_p0 }
  0x37   : > { %p2110_p13 = pneg %p2109_p2 }
  0x38   : > { %1975 = dma.hbm_to_vmem [thread:$0]  (!%p2395_p11), %s2875_s11, 128, %s468_s19, [#allocation9]  }
  0x39   : > { %p2117_p3 = pnand %p2116_p4, %p2110_p13 }
  0x3b   : > { %2120 = shalt.err (!%p2117_p3)
}
  0x3c   : > { %s2876_s10 = sld [smem:[#allocation22_spill]]  ;;  %s2254_s15 = smov [#allocation10]  }
  0x3d   : > { %s483_s19 = sshll.u32 %s2254_s15, 4  ;;  %s484_s19 = int_to_ptr.vmem [resolvable:$true] %s483_s19 }
  0x3e   : > { %s2132_s20 = scalar_lea.vmem %s484_s19, 2048  ;;  %p2140_p10 = scmp.lt.s32.totalorder %s484_s19, %s484_s19 }
  0x3f   : > { %p2133_p5 = scmp.ne.s32.totalorder %s484_s19, %s2132_s20  ;;  %p2141_p6 = scmp.lt.s32.totalorder %s2132_s20, %s2132_s20 }
  0x41   : > { %p2135_p1 = pnand %p2133_p5, %p2045_p12  ;;  %p2142_p4 = por %p2141_p6, %p2140_p10 }
  0x42   : > { %1972 = dma.hbm_to_vmem [thread:$0]  (!%p2395_p11), %s2876_s10, 128, %s457_s26, [#allocation6]  }
  0x43   : > { %p2136_p2 = pneg %p2135_p1 }
  0x45   : > { %p2143_p7 = pnand %p2142_p4, %p2136_p2 }
  0x47   : > { %2146 = shalt.err (!%p2143_p7)
}
  0x48   : > { %s2877_s14 = sld [smem:[#allocation24_spill]]  ;;  %s2440_s21 = sadd.s32 1, %s2247_s24  }
  0x49   : > { %s41_s17 = sadd.s32 1, %s2243_s23  ;;  %s38_s16 = ssub.s32 %s2247_s24, %s2440_s21 }
  0x4a   : > { %p48_p12 = scmp.ne.s32.totalorder %s2243_s23, %s2239_s22  ;;  %p39_p9 = scmp.eq.s32.totalorder %s38_s16, 0 }
  0x4b   : > { %p49_p13 = scmp.eq.s32.totalorder %s2247_s24, 0  ;;  %p2878_p0 = scmp.eq.s32.totalorder %s2367_s25, 1 }
  0x4c   : > { %p1991_p5 = scmp.lt.s32.totalorder %s2247_s24, 2  ;;  %s500_s20 = sand.u32 1, %s2243_s23  }
  0x4d   : > { %p2450_p3 = por %p2878_p0, %p48_p12  ;;  %p50_p1 = por %p49_p13, %p48_p12 }
  0x4e   : > { %1978 = dma.hbm_to_vmem [thread:$0]  (!%p2395_p11), %s2877_s14, 2048, %s484_s19, [#allocation9], %s2855_s30, %s2855_s30, %s2856_s18  }
  0x4f   : > { %s2879_s0 = scalar_select %p2450_p3, 1, 0 }
  0x50   : > { %s2456_s15 = scalar_select %p39_p9, %s2243_s23, %s41_s17  }
  0x51   : > { %s1691_s26 = sshll.u32 %s500_s20, 4  ;;  %s1722_s19 = sshll.u32 %s2247_s24, 8 }
  0x52   : > { %2880 = sst [smem:[#allocation19_spill]] %s2456_s15  ;;  %s504_s16 = scalar_lea.vmem [#allocation2], %s1691_s26 }
  0x53   : > { %s2881_s18 = sld [smem:[#allocation20_spill]]  ;;  %s511_s10 = sshll.u32 %s504_s16, 4  ;;  %s2465_s10 = int_to_ptr.vmem [resolvable:$true] %s511_s10 }
  0x54   : > { %p2467_p11 = pnand %p1991_p5, %p50_p1  ;;  %s2471_s17 = scalar_lea.sflag [#allocation3], %s500_s20 }
  0x56   : > { %p2149_p10 = pneg %p2467_p11 }
  0x59   : > { %s2463_s3 = scalar_lea.hbm %s2881_s18, %s1722_s19  ;;  %s2152_s26 = scalar_lea.hbm %s2881_s18, 512 }
  0x5a   : > { %s2147_s14 = scalar_lea.hbm %s2463_s3, 256  ;;  %p2153_p7 = scmp.lt.s32.totalorder %s2463_s3, %s2881_s18 }
  0x5b   : > { %p2148_p2 = scmp.ne.s32.totalorder %s2463_s3, %s2147_s14  ;;  %p2154_p12 = scmp.lt.s32.totalorder %s2152_s26, %s2147_s14 }
  0x5d   : > { %p2150_p6 = pnand %p2149_p10, %p2148_p2  ;;  %p2155_p9 = por %p2154_p12, %p2153_p7 }
  0x5f   : > { %p2151_p4 = pneg %p2150_p6 }
  0x61   : > { %p2156_p13 = pnand %p2155_p9, %p2151_p4 }
  0x63   : > { %2159 = shalt.err (!%p2156_p13)
}
  0x64   : > { %s2160_s20 = scalar_lea.vmem %s2465_s10, 256  ;;  %s2255_s15 = smov [#allocation2]  }
  0x65   : > { %p2161_p0 = scmp.ne.s32.totalorder %s2465_s10, %s2160_s20  ;;  %s2165_s23 = sshll.u32 %s2255_s15, 4  ;;  %s2166_s23 = int_to_ptr.vmem [resolvable:$false] %s2165_s23 }
  0x66   : > { %s2167_s30 = scalar_lea.vmem %s2166_s23, 512  ;;  %p2168_p2 = scmp.lt.s32.totalorder %s2465_s10, %s2166_s23 }
  0x67   : > { %p2163_p5 = pnand %p2161_p0, %p2149_p10  ;;  %p2169_p6 = scmp.lt.s32.totalorder %s2167_s30, %s2160_s20 }
  0x69   : > { %p2164_p1 = pneg %p2163_p5  ;;  %p2170_p3 = por %p2169_p6, %p2168_p2 }
  0x6b   : > { %p2171_p8 = pnand %p2170_p3, %p2164_p1 }
  0x6d   : > { %2174 = shalt.err (!%p2171_p8)
}
  0x6e   : > { %s2883_s14 = smov 8   ;;  %s2884_s19 = smov 128  }
  0x6f   : > { %1982 = dma.hbm_to_vmem [thread:$0]  (!%p2467_p11), %s2463_s3, 256, %s2465_s10, %s2471_s17, %s2884_s19, %s2884_s19, %s2883_s14  }
  0x70   : > { %p2885_p10 = scmp.ne.s32.totalorder %s2872_s29, 0 }
  0x71   : > { %s2498_s15 = sand.u32 (!%p2885_p10), 1, %s2239_s22   ;;  %p2886_p8 = scmp.ne.s32.totalorder (!%p2885_p10), %s2869_s27, 0 }
  0x72   : > { %523 = sbr.rel (%p2885_p10) target bundleno = 1320 (0x528), region = 84  ;;  %s1695_s23 = sshll.u32 (!%p2885_p10), %s2498_s15, 4 }
  0x73   : > { %s526_s26 = scalar_lea.sflag (!%p2885_p10), [#allocation3], %s2498_s15  ;;  %s529_s28 = scalar_lea.vmem (!%p2885_p10), [#allocation2], %s1695_s23 }
  0x77   : > { %2218 = dma.done.wait (%p2886_p8), %s526_s26, 256  }
  0x78   : > { %2220 = vsyncadd (%p2886_p8), %s526_s26, 4294967040  ;;  %p2887_p3 = scmp.eq.s32.totalorder %s2367_s25, 0 }
  0x7a   : > { %2222 = dma.done.wait (%p2887_p3), [#allocation6], 896   ;;  %p2888_p11 = pmov %p2887_p3 }
  0x7b   : > { %p2889_p4 = pmov %p2887_p3 }
  0x7c   : > { %2224 = vsyncadd (%p2888_p11), [#allocation6], 4294966400 }
  0x7d   : > { %2226 = dma.done.wait (%p2889_p4), [#allocation9], 2176   ;;  %p2890_p7 = pmov %p2887_p3 }
  0x7e   : > { %vm618_vm0 = vcmask 130048   ;;  %v2514_v0 = vld [vmem:[%s529_s28 + $0x8] sm:$0xff]  ;;  %v1701_v1 = vld [vmem:[%s2833_s1] ss:$0 sm:$0xff]  ;;  %v731_v10 = vld [vmem:[#allocation5 + $0x10] sm:$0xff]  ;;  %v2256_v14 = vmov 0.0   ;;  %v704_v37 = vlaneseq }
  0x7f   : > { %2228 = vsyncadd (%p2890_p7), [#allocation9], 4294965120  ;;  %v1702_v2 = vld [vmem:[%s2834_s2] ss:$0 sm:$0xff]  ;;  %v604_v3 = vmul.f32 %v1701_v1, %v2514_v0  ;;  %v617_v9 = vld [vmem:[#allocation5 + $0x8] sm:$0xff]  ;;  %1817 = vmatprep.subr.mxu1 %v2256_v14  ;;  %s2257_s30 = smov 120  }
  0x80   : > { %v2523_v4 = vld [vmem:[%s529_s28] sm:$0xff]  ;;  %v732_v11 = vld [vmem:[#allocation5 + $0x18] sm:$0xff]  ;;  %v848_v13 = vld [vmem:[#allocation5 + $0x28] sm:$0xff]  ;;  %s2258_s14 = smov 8   ;;  %vm2259_vm1 = vmmov 0   ;;  %v2638_v38 = vshrl.u32 %v704_v37, 7 }
  0x81   : > { %v616_v5 = vld [vmem:[#allocation5] sm:$0xff]  ;;  %v603_v6 = vmul.f32 %v1701_v1, %v2523_v4  ;;  %v613_v7 = vadd.f32 %v1702_v2, %v604_v3  ;;  %v995_v15 = vld [vmem:[%s2838_s6 + $0x78] sm:$0xff]  ;;  %v994_v17 = vld [vmem:[%s2838_s6 + $0x70] sm:$0xff]  ;;  %1849 = vmatprep.mubr.msk.f32.mxu1 %vm2259_vm1, %v2256_v14  ;;  %vm1070_vm2 = vcmask 64512   ;;  %s2891_s29 = sld [smem:[#allocation25_spill]]  ;;  %s1563_s3 = scalar_lea.sflag [#allocation4], %s2498_s15 }
  0x82   : > { %1800 = vmatprep.mubr.msk.f32.mxu0 %vm618_vm0, %v616_v5  ;;  %v847_v12 = vld [vmem:[#allocation5 + $0x20] sm:$0xff]  ;;  %1818 = vmatpush3.msra.mxu1 %v995_v15  ;;  %v993_v19 = vld [vmem:[%s2838_s6 + $0x68] sm:$0xff]  ;;  %v991_v22 = vld [vmem:[%s2838_s6 + $0x58] sm:$0xff]  ;;  %v706_v39 = vsub.s32 0, %v2638_v38  ;;  %v712_v40 = vsub.s32 1, %v2638_v38  ;;  %v724_v44 = vsub.s32 2, %v2638_v38 }
  0x83   : > { %v612_v8 = vadd.f32 %v1702_v2, %v603_v6  ;;  %1796 = vmatprep.subr.mxu0 %v613_v7  ;;  %1819 = vmatprep.subr.mxu1 %v2256_v14  ;;  %v992_v21 = vld [vmem:[%s2838_s6 + $0x60] sm:$0xff]  ;;  %v990_v24 = vld [vmem:[%s2838_s6 + $0x50] sm:$0xff]  ;;  %v989_v26 = vld [vmem:[%s2838_s6 + $0x48] sm:$0xff]  ;;  %v820_v48 = vsub.s32 3, %v2638_v38  ;;  %v828_v50 = vsub.s32 4, %v2638_v38  ;;  %v840_v54 = vsub.s32 5, %v2638_v38 }
  0x84   : > { %1797 = vmatpush3.msra.mxu0 %v613_v7  ;;  %1820 = vmatpush3.msra.mxu1 %v994_v17  ;;  %v988_v27 = vld [vmem:[%s2838_s6 + $0x40] sm:$0xff]  ;;  %v987_v29 = vld [vmem:[%s2838_s6 + $0x38] sm:$0xff]  ;;  %v986_v30 = vld [vmem:[%s2838_s6 + $0x30] sm:$0xff]  ;;  %v936_v3 = vsub.s32 6, %v2638_v38  ;;  %s2892_s23 = sld [smem:[#allocation26_spill]]  ;;  %p2894_p9 = scmp.ne.s32.totalorder %s2879_s0, 0 }
  0x85   : > { %1798 = vmatprep.subr.mxu0 %v612_v8  ;;  %1821 = vmatprep.subr.mxu1 %v2256_v14  ;;  %v985_v31 = vld [vmem:[%s2838_s6 + $0x28] sm:$0xff]  ;;  %v984_v32 = vld [vmem:[%s2838_s6 + $0x20] sm:$0xff]  ;;  %v983_v33 = vld [vmem:[%s2838_s6 + $0x18] sm:$0xff]  ;;  %s2260_s11 = smov [#allocation11]  }
  0x86   : > { %1799 = vmatpush3.msra.mxu0 %v612_v8  ;;  %1822 = vmatpush3.msra.mxu1 %v993_v19  ;;  %v982_v34 = vld [vmem:[%s2838_s6 + $0x10] sm:$0xff]  ;;  %v981_v35 = vld [vmem:[%s2838_s6 + $0x8] sm:$0xff]  ;;  %v980_v36 = vld [vmem:[%s2838_s6] sm:$0xff] }
  0x87   : > { %1801 = vmatmul.mubr.msk.f32.vlgmr.msra.gmra.mxu0 %vm618_vm0, %v617_v9  ;;  %1803 = vmatprep.subr.mxu0 %v613_v7  ;;  %v614_v41 = vld [vmem:[%s2836_s4] sm:$0xff]  ;;  %v944_v9 = vsub.s32 7, %v2638_v38 }
  0x88   : > { %1804 = vmatpush3.msra.mxu0 %v613_v7  ;;  %1807 = vmatprep.mubr.msk.f32.mxu0 %vm618_vm0, %v731_v10  ;;  %v707_v42 = vrot.slane %v614_v41, %v706_v39  ;;  %v713_v43 = vrot.slane %v614_v41, %v712_v40  ;;  %v725_v51 = vrot.slane %v614_v41, %v724_v44  ;;  %v1710_v44 = vld [vmem:[%s2837_s5] ss:$0 sm:$0xff] }
  0x89   : > { %1805 = vmatprep.subr.mxu0 %v612_v8  ;;  %1823 = vmatprep.subr.mxu1 %v2256_v14  ;;  %v821_v58 = vrot.slane %v614_v41, %v820_v48  ;;  %v829_v59 = vrot.slane %v614_v41, %v828_v50  ;;  %v841_v2 = vrot.slane %v614_v41, %v840_v54  ;;  %v1717_v38 = vld [vmem:[%s2891_s29] ss:$0 sm:$0xff] }
  0x8a   : > { %1806 = vmatpush3.msra.mxu0 %v612_v8  ;;  %1824 = vmatpush3.msra.mxu1 %v992_v21  ;;  %v937_v17 = vrot.slane %v614_v41, %v936_v3  ;;  %v1479_v3 = vld [vmem:[#allocation10 + $0x60] sm:$0xff]  ;;  %s2893_s26 = smov %s2892_s23 }
  0x8b   : > { %1808 = vmatmul.mubr.msk.f32.vlgmr.msra.gmra.mxu0 %vm618_vm0, %v732_v11  ;;  %1810 = vmatprep.subr.mxu0 %v613_v7 }
  0x8c   : > { %1811 = vmatpush3.msra.mxu0 %v613_v7  ;;  %1814 = vmatprep.mubr.msk.f32.mxu0 %vm618_vm0, %v847_v12 }
  0x8d   : > { %1812 = vmatprep.subr.mxu0 %v612_v8  ;;  %1825 = vmatprep.subr.mxu1 %v2256_v14 }
  0x8e   : > { %1813 = vmatpush3.msra.mxu0 %v612_v8  ;;  %1826 = vmatpush3.msra.mxu1 %v991_v22 }
  0x8f   : > { %1815 = vmatmul.mubr.msk.f32.vlgmr.msra.gmra.mxu0 %vm618_vm0, %v848_v13  ;;  %1852 = vmatprep.subr.mxu0 %v2256_v14 }
  0x90   : > { %1827 = vmatprep.subr.mxu1 %v2256_v14  ;;  %1854 = vmatprep.mubr.msk.f32.mxu0 %vm2259_vm1, %v2256_v14 }
  0x91   : > { %1828 = vmatpush3.msra.mxu1 %v990_v24  ;;  %v945_v24 = vrot.slane %v614_v41, %v944_v9  ;;  %v1474_v9 = vld [vmem:[#allocation10 + $0x38] sm:$0xff] }
  0x92   : > { %1829 = vmatprep.subr.mxu1 %v2256_v14 }
  0x93   : > { %1830 = vmatpush3.msra.mxu1 %v989_v26 }
  0x94   : > { %1831 = vmatprep.subr.mxu1 %v2256_v14 }
  0x95   : > { %1832 = vmatpush3.msra.mxu1 %v988_v27 }
  0x96   : > { %1833 = vmatprep.subr.mxu1 %v2256_v14 }
  0x97   : > { %1834 = vmatpush3.msra.mxu1 %v987_v29 }
  0x98   : > { %1835 = vmatprep.subr.mxu1 %v2256_v14 }
  0x99   : > { %1836 = vmatpush3.msra.mxu1 %v986_v30 }
  0x9a   : > { %1837 = vmatprep.subr.mxu1 %v2256_v14 }
  0x9b   : > { %1838 = vmatpush3.msra.mxu1 %v985_v31 }
  0x9c   : > { %1839 = vmatprep.subr.mxu1 %v2256_v14 }
  0x9d   : > { %1840 = vmatpush3.msra.mxu1 %v984_v32 }
  0x9e   : > { %1841 = vmatprep.subr.mxu1 %v2256_v14 }
  0x9f   : > { %1842 = vmatpush3.msra.mxu1 %v983_v33 }
  0xa0   : > { %1843 = vmatprep.subr.mxu1 %v2256_v14 }
  0xa1   : > { %1844 = vmatpush3.msra.mxu1 %v982_v34 }
  0xa2   : > { %1845 = vmatprep.subr.mxu1 %v2256_v14 }
  0xa3   : > { %1846 = vmatpush3.msra.mxu1 %v981_v35 }
  0xa4   : > { %1847 = vmatprep.subr.mxu1 %v2256_v14 }
  0xa5   : > { %1848 = vmatpush3.msra.mxu1 %v980_v36 }
  0xa6   : > { %1911 = vmatprep.subr.mxu1 %v2256_v14 }
 0x147   : > { %v2537_v16 = vpop.f32.mrf.mxu0 }
 0x148   : > { %720 = vrot.lane.b32.xlu1 %v2537_v16, %s2257_s30  ;;  %702 = vrot.lane.b32.xlu0 %v2537_v16, %s2258_s14  ;;  %v715_v49 = vmul.f32 %v2537_v16, %v713_v43 }
 0x149   : > { %v2547_v18 = vpop.f32.mrf.mxu0 }
 0x14a   : > { %v714_v55 = vmul.f32 %v713_v43, %v2547_v18 }
 0x14b   : > { %v2553_v20 = vpop.f32.mrf.mxu0 }
 0x14c   : > { %718 = vrot.lane.b32.xlu1 %v2547_v18, %s2257_s30  ;;  %700 = vrot.lane.b32.xlu0 %v2547_v18, %s2258_s14  ;;  %v831_v10 = vmul.f32 %v2553_v20, %v829_v59 }
 0x14d   : > { %v2566_v23 = vpop.f32.mrf.mxu0 }
 0x14e   : > { %v830_v11 = vmul.f32 %v829_v59, %v2566_v23 }
 0x14f   : > { %v2577_v25 = vpop.f32.mrf.mxu0 }
 0x150   : > { %816 = vrot.lane.b32.xlu1 %v2553_v20, %s2258_s14  ;;  %814 = vrot.lane.b32.xlu0 %v2566_v23, %s2258_s14 }
 0x151   : > { %v2590_v28 = vpop.f32.mrf.mxu0 }
 0x152   : > { %v946_v33 = vmul.f32 %v945_v24, %v2590_v28 }
 0x154   : > { %836 = vrot.lane.b32.xlu1 %v2553_v20, %s2257_s30  ;;  %834 = vrot.lane.b32.xlu0 %v2566_v23, %s2257_s30  ;;  %v1709_v20 = vld [vmem:[%s2836_s4 + $0x8] ss:$0 sm:$0xff]  ;;  %v947_v23 = vmul.f32 %v2577_v25, %v945_v24  ;;  %v1388_v24 = vld [vmem:[%s2844_s12 + $0x78] sm:$0xff] }
 0x158   : > { %932 = vrot.lane.b32.xlu1 %v2577_v25, %s2258_s14  ;;  %930 = vrot.lane.b32.xlu0 %v2590_v28, %s2258_s14  ;;  %s1700_s14 = sshll.u32 %s2498_s15, 3 }
 0x159   : > { %s593_s17 = scalar_lea.vmem [#allocation11], %s1700_s14 }
 0x15a   : > { %s1576_s16 = sshll.u32 %s593_s17, 4  ;;  %s1577_s16 = int_to_ptr.vmem [resolvable:$true] %s1576_s16 }
 0x15b   : > { %s2175_s10 = scalar_lea.vmem %s1577_s16, 128 }
 0x15c   : > { %952 = vrot.lane.b32.xlu1 %v2577_v25, %s2257_s30  ;;  %950 = vrot.lane.b32.xlu0 %v2590_v28, %s2257_s30  ;;  %s1719_s30 = sshll.u32 %s2367_s25, 7  ;;  %p2176_p12 = scmp.ne.s32.totalorder %s1577_s16, %s2175_s10 }
 0x15d   : > { %s1574_s28 = scalar_lea.hbm %s2892_s23, %s1719_s30  ;;  %s2179_s25 = sshll.u32 %s2260_s11, 4  ;;  %s2180_s25 = int_to_ptr.vmem [resolvable:$false] %s2179_s25 }
 0x15e   : > { %p2177_p13 = pnand %p2176_p12, %p2894_p9  ;;  %s2181_s14 = scalar_lea.vmem %s2180_s25, 256 }
 0x15f   : > { %p2182_p5 = scmp.lt.s32.totalorder %s1577_s16, %s2180_s25  ;;  %p2183_p1 = scmp.lt.s32.totalorder %s2181_s14, %s2175_s10 }
 0x160   : > { %p2178_p0 = pneg %p2177_p13 }
 0x161   : > { %p2184_p2 = por %p2183_p1, %p2182_p5 }
 0x163   : > { %p2185_p6 = pnand %p2184_p2, %p2178_p0 }
 0x1ba   : > { %v721_v45 = vpop.permute.xlu1 %720  ;;  %v703_v46 = vpop.permute.xlu0 %702 }
 0x1bb   : > { %v709_v47 = vmul.f32 %v707_v42, %v703_v46  ;;  %v727_v60 = vmul.f32 %v725_v51, %v721_v45 }
 0x1bd   : > { %v717_v56 = vadd.f32 %v715_v49, %v709_v47 }
 0x1be   : > { %v719_v52 = vpop.permute.xlu1 %718  ;;  %v701_v53 = vpop.permute.xlu0 %700 }
 0x1bf   : > { %v708_v57 = vmul.f32 %v707_v42, %v701_v53  ;;  %v726_v61 = vmul.f32 %v725_v51, %v719_v52  ;;  %v729_v5 = vadd.f32 %v727_v60, %v717_v56  ;;  %v1068_v56 = vld [vmem:[%s2840_s8] sm:$0xff] }
 0x1c0   : > { %1853 = vmatpush3.msra.mxu0 %v1068_v56 }
 0x1c1   : > { %v716_v62 = vadd.f32 %v714_v55, %v708_v57  ;;  %1857 = vmatprep.subr.mxu0 %v2256_v14  ;;  %v996_v57 = vld [vmem:[%s2839_s7] sm:$0x1] }
 0x1c2   : > { %v817_v63 = vpop.permute.xlu1 %816  ;;  %v815_v1 = vpop.permute.xlu0 %814 }
 0x1c3   : > { %v823_v6 = vmul.f32 %v821_v58, %v817_v63  ;;  %v728_v7 = vadd.f32 %v726_v61, %v716_v62  ;;  %v822_v8 = vmul.f32 %v821_v58, %v815_v1  ;;  %v1150_v62 = vld [vmem:[#allocation7] sm:$0xff]  ;;  %v1482_v63 = vld [vmem:[#allocation10 + $0x78] sm:$0xff] }
 0x1c4   : > { %v1481_v1 = vld [vmem:[#allocation10 + $0x70] sm:$0xff] }
 0x1c5   : > { %v825_v12 = vadd.f32 %v823_v6, %v729_v5  ;;  %v824_v13 = vadd.f32 %v822_v8, %v728_v7  ;;  %v1478_v5 = vld [vmem:[#allocation10 + $0x58] sm:$0xff]  ;;  %v1477_v6 = vld [vmem:[#allocation10 + $0x50] sm:$0xff]  ;;  %v1476_v7 = vld [vmem:[#allocation10 + $0x48] sm:$0xff] }
 0x1c6   : > { %v837_v15 = vpop.permute.xlu1 %836  ;;  %v835_v16 = vpop.permute.xlu0 %834  ;;  %v1475_v8 = vld [vmem:[#allocation10 + $0x40] sm:$0xff] }
 0x1c7   : > { %v833_v18 = vadd.f32 %v831_v10, %v825_v12  ;;  %v843_v19 = vmul.f32 %v841_v2, %v837_v15  ;;  %v832_v21 = vadd.f32 %v830_v11, %v824_v13  ;;  %v842_v22 = vmul.f32 %v841_v2, %v835_v16  ;;  %v1480_v2 = vld [vmem:[#allocation10 + $0x68] sm:$0xff]  ;;  %v1473_v10 = vld [vmem:[#allocation10 + $0x30] sm:$0xff]  ;;  %v1069_v12 = vld [vmem:[%s2841_s9] sm:$0x1] }
 0x1c8   : > { %v1472_v11 = vld [vmem:[#allocation10 + $0x28] sm:$0xff] }
 0x1c9   : > { %v845_v29 = vadd.f32 %v843_v19, %v833_v18  ;;  %v844_v30 = vadd.f32 %v842_v22, %v832_v21  ;;  %v1224_v22 = vld [vmem:[#allocation8] sm:$0xff] }
 0x1ca   : > { %v933_v26 = vpop.permute.xlu1 %932  ;;  %v931_v27 = vpop.permute.xlu0 %930 }
 0x1cb   : > { %v939_v31 = vmul.f32 %v937_v17, %v933_v26  ;;  %v938_v32 = vmul.f32 %v937_v17, %v931_v27  ;;  %v1387_v26 = vld [vmem:[%s2844_s12 + $0x70] sm:$0xff]  ;;  %v1384_v27 = vld [vmem:[%s2844_s12 + $0x58] sm:$0xff] }
 0x1cd   : > { %v941_v34 = vadd.f32 %v939_v31, %v845_v29  ;;  %v940_v35 = vadd.f32 %v938_v32, %v844_v30  ;;  %v1383_v29 = vld [vmem:[%s2844_s12 + $0x50] sm:$0xff]  ;;  %v1382_v30 = vld [vmem:[%s2844_s12 + $0x48] sm:$0xff]  ;;  %v1381_v31 = vld [vmem:[%s2844_s12 + $0x40] sm:$0xff] }
 0x1ce   : > { %v953_v36 = vpop.permute.xlu1 %952  ;;  %v951_v37 = vpop.permute.xlu0 %950  ;;  %v1380_v32 = vld [vmem:[%s2844_s12 + $0x38] sm:$0xff] }
 0x1cf   : > { %v949_v40 = vadd.f32 %v947_v23, %v941_v34  ;;  %v959_v41 = vmul.f32 %v1709_v20, %v953_v36  ;;  %v948_v42 = vadd.f32 %v946_v33, %v940_v35  ;;  %v958_v43 = vmul.f32 %v1709_v20, %v951_v37  ;;  %v1379_v20 = vld [vmem:[%s2844_s12 + $0x30] sm:$0xff]  ;;  %v1378_v23 = vld [vmem:[%s2844_s12 + $0x28] sm:$0xff]  ;;  %v1377_v33 = vld [vmem:[%s2844_s12 + $0x20] sm:$0xff] }
 0x1d0   : > { %v1376_v34 = vld [vmem:[%s2844_s12 + $0x18] sm:$0xff]  ;;  %v1471_v35 = vld [vmem:[#allocation10 + $0x20] sm:$0xff]  ;;  %v1375_v36 = vld [vmem:[%s2844_s12 + $0x10] sm:$0xff] }
 0x1d1   : > { %v961_v45 = vadd.f32 %v959_v41, %v949_v40  ;;  %v960_v46 = vadd.f32 %v958_v43, %v948_v42  ;;  %v1470_v37 = vld [vmem:[#allocation10 + $0x18] sm:$0xff]  ;;  %v1374_v40 = vld [vmem:[%s2844_s12 + $0x8] sm:$0xff]  ;;  %v1469_v41 = vld [vmem:[#allocation10 + $0x10] sm:$0xff] }
 0x1d2   : > { %v1373_v42 = vld [vmem:[%s2844_s12] sm:$0xff]  ;;  %v1468_v43 = vld [vmem:[#allocation10 + $0x8] sm:$0xff] }
 0x1d3   : > { %v2665_v47 = vadd.f32 %v1710_v44, %v961_v45  ;;  %v2667_v48 = vadd.f32 %v1710_v44, %v960_v46  ;;  %v1467_v44 = vld [vmem:[#allocation10] sm:$0xff] }
 0x1d5   : > { %v972_v25 = vmax.f32 %v2665_v47, 0.0  ;;  %v971_v28 = vmax.f32 %v2667_v48, 0.0 }
 0x1d7   : > { %v973_v49 = vadd.f32 %v972_v25, %v971_v28 }
 0x1d9   : > { %v974_v50 = vrot.slane %v973_v49, 4 }
 0x1db   : > { %v975_v51 = vadd.f32 %v974_v50, %v973_v49 }
 0x1dd   : > { %v976_v52 = vrot.slane %v975_v51, 2 }
 0x1df   : > { %v977_v53 = vadd.f32 %v976_v52, %v975_v51 }
 0x1e1   : > { %v978_v54 = vrot.slane %v977_v53, 1 }
 0x1e3   : > { %v979_v55 = vadd.f32 %v978_v54, %v977_v53 }
 0x1e5   : > { %1850 = vmatmul.mubr.f32.vlgmr.msra.gmra.mxu1 %v979_v55 }
 0x1e6   : > { %1943 = vmatprep.mubr.msk.f32.mxu1 %vm2259_vm1, %v2256_v14  ;;  %1912 = vmatpush3.msra.mxu1 %v1482_v63 }
 0x1e7   : > { %1913 = vmatprep.subr.mxu1 %v2256_v14 }
 0x1e8   : > { %1914 = vmatpush3.msra.mxu1 %v1481_v1 }
 0x1e9   : > { %1915 = vmatprep.subr.mxu1 %v2256_v14 }
 0x1ea   : > { %1916 = vmatpush3.msra.mxu1 %v1480_v2 }
 0x1eb   : > { %1917 = vmatprep.subr.mxu1 %v2256_v14 }
 0x1ec   : > { %1918 = vmatpush3.msra.mxu1 %v1479_v3 }
 0x1ed   : > { %1919 = vmatprep.subr.mxu1 %v2256_v14 }
 0x1ee   : > { %1920 = vmatpush3.msra.mxu1 %v1478_v5 }
 0x1ef   : > { %1921 = vmatprep.subr.mxu1 %v2256_v14 }
 0x1f0   : > { %1922 = vmatpush3.msra.mxu1 %v1477_v6 }
 0x1f1   : > { %1923 = vmatprep.subr.mxu1 %v2256_v14 }
 0x1f2   : > { %1924 = vmatpush3.msra.mxu1 %v1476_v7 }
 0x1f3   : > { %1925 = vmatprep.subr.mxu1 %v2256_v14 }
 0x1f4   : > { %1926 = vmatpush3.msra.mxu1 %v1475_v8 }
 0x1f5   : > { %1927 = vmatprep.subr.mxu1 %v2256_v14 }
 0x1f6   : > { %1928 = vmatpush3.msra.mxu1 %v1474_v9 }
 0x1f7   : > { %1929 = vmatprep.subr.mxu1 %v2256_v14 }
 0x1f8   : > { %1930 = vmatpush3.msra.mxu1 %v1473_v10 }
 0x1f9   : > { %1931 = vmatprep.subr.mxu1 %v2256_v14 }
 0x1fa   : > { %1932 = vmatpush3.msra.mxu1 %v1472_v11 }
 0x1fb   : > { %1933 = vmatprep.subr.mxu1 %v2256_v14 }
 0x1fc   : > { %1934 = vmatpush3.msra.mxu1 %v1471_v35 }
 0x1fd   : > { %1935 = vmatprep.subr.mxu1 %v2256_v14 }
 0x1fe   : > { %1936 = vmatpush3.msra.mxu1 %v1470_v37 }
 0x1ff   : > { %1937 = vmatprep.subr.mxu1 %v2256_v14 }
 0x200   : > { %1938 = vmatpush3.msra.mxu1 %v1469_v41 }
 0x201   : > { %1939 = vmatprep.subr.mxu1 %v2256_v14 }
 0x202   : > { %1940 = vmatpush3.msra.mxu1 %v1468_v43 }
 0x203   : > { %1941 = vmatprep.subr.mxu1 %v2256_v14 }
 0x204   : > { %1942 = vmatpush3.msra.mxu1 %v1467_v44 }
 0x2a5   : > { %v1063_v58 = vpop.f32.mrf.mxu1 }
 0x2a6   : > { %v1064_v59 = vadd.f32 %v1063_v58, %v996_v57 }
 0x2a7   : > { %v1851_v60 = vpop.f32.mrf.mxu1 }
 0x2a8   : > { %v1067_v61 = vmax.f32 %v1064_v59, 0.0 }
 0x2aa   : > { %1855 = vmatmul.mubr.msk.f32.vlgmr.msra.gmra.mxu0 %vm1070_vm2, %v1067_v61 }
 0x2ab   : > { %1859 = vmatprep.mubr.msk.f32.mxu0 %vm2259_vm1, %v2256_v14  ;;  %1858 = vmatpush3.msra.mxu0 %v1150_v62 }
 0x2ac   : > { %1862 = vmatprep.subr.mxu0 %v2256_v14 }
 0x36a   : > { %v1140_v13 = vpop.f32.mrf.mxu0 }
 0x36b   : > { %v1141_v15 = vadd.f32 %v1140_v13, %v1069_v12 }
 0x36c   : > { %v1856_v16 = vpop.f32.mrf.mxu0 }
 0x36d   : > { %v1712_v17 = vmul.f32 -1.442695, %v1141_v15 }
 0x36f   : > { %2039 = vpow2.f32 %v1712_v17 }
 0x37c   : > { %v2040_v18 = vpop.eup %2039 }
 0x37d   : > { %v1147_v19 = vadd.f32 1.0, %v2040_v18 }
 0x37f   : > { %2041 = vrcp.f32 %v1147_v19 }
 0x38c   : > { %v2042_v21 = vpop.eup %2041 }
 0x38d   : > { %1860 = vmatmul.mubr.msk.f32.vlgmr.msra.gmra.mxu0 %vm1070_vm2, %v2042_v21 }
 0x38e   : > { %1863 = vmatpush3.msra.mxu0 %v972_v25  ;;  %1866 = vmatprep.mubr.msk.f32.mxu0 %vm2259_vm1, %v2256_v14 }
 0x38f   : > { %1864 = vmatprep.subr.mxu0 %v2256_v14 }
 0x390   : > { %1865 = vmatpush3.msra.mxu0 %v971_v28 }
 0x391   : > { %1869 = vmatprep.subr.mxu0 %v2256_v14  ;;  %1867 = vmatmul.mubr.msk.f32.vlgmr.msra.gmra.mxu0 %vm618_vm0, %v1224_v22 }
 0x392   : > { %1870 = vmatpush3.msra.mxu0 %v2514_v0  ;;  %1873 = vmatprep.mubr.msk.f32.mxu0 %vm2259_vm1, %v2256_v14  ;;  %v1386_v0 = vld [vmem:[%s2844_s12 + $0x68] sm:$0xff] }
 0x393   : > { %1871 = vmatprep.subr.mxu0 %v2256_v14 }
 0x394   : > { %1872 = vmatpush3.msra.mxu0 %v2523_v4  ;;  %v1385_v4 = vld [vmem:[%s2844_s12 + $0x60] sm:$0xff] }
 0x395   : > { %1874 = vmatmul.mubr.msk.f32.vlgmr.msra.gmra.mxu0 %vm618_vm0, %v1224_v22  ;;  %1876 = vmatprep.subr.mxu0 %v2256_v14 }
 0x396   : > { %1877 = vmatpush3.msra.mxu0 %v1388_v24  ;;  %1908 = vmatprep.mubr.msk.f32.mxu0 %vm2259_vm1, %v2256_v14 }
 0x397   : > { %1878 = vmatprep.subr.mxu0 %v2256_v14 }
 0x398   : > { %1879 = vmatpush3.msra.mxu0 %v1387_v26 }
 0x399   : > { %1880 = vmatprep.subr.mxu0 %v2256_v14 }
 0x39a   : > { %1881 = vmatpush3.msra.mxu0 %v1386_v0 }
 0x39b   : > { %1882 = vmatprep.subr.mxu0 %v2256_v14 }
 0x39c   : > { %1883 = vmatpush3.msra.mxu0 %v1385_v4 }
 0x39d   : > { %1884 = vmatprep.subr.mxu0 %v2256_v14 }
 0x39e   : > { %1885 = vmatpush3.msra.mxu0 %v1384_v27 }
 0x39f   : > { %1886 = vmatprep.subr.mxu0 %v2256_v14 }
 0x3a0   : > { %1887 = vmatpush3.msra.mxu0 %v1383_v29 }
 0x3a1   : > { %1888 = vmatprep.subr.mxu0 %v2256_v14 }
 0x3a2   : > { %1889 = vmatpush3.msra.mxu0 %v1382_v30 }
 0x3a3   : > { %1890 = vmatprep.subr.mxu0 %v2256_v14 }
 0x3a4   : > { %1891 = vmatpush3.msra.mxu0 %v1381_v31 }
 0x3a5   : > { %1892 = vmatprep.subr.mxu0 %v2256_v14 }
 0x3a6   : > { %1893 = vmatpush3.msra.mxu0 %v1380_v32 }
 0x3a7   : > { %1894 = vmatprep.subr.mxu0 %v2256_v14 }
 0x3a8   : > { %1895 = vmatpush3.msra.mxu0 %v1379_v20 }
 0x3a9   : > { %1896 = vmatprep.subr.mxu0 %v2256_v14 }
 0x3aa   : > { %1897 = vmatpush3.msra.mxu0 %v1378_v23 }
 0x3ab   : > { %1898 = vmatprep.subr.mxu0 %v2256_v14 }
 0x3ac   : > { %1899 = vmatpush3.msra.mxu0 %v1377_v33 }
 0x3ad   : > { %1900 = vmatprep.subr.mxu0 %v2256_v14 }
 0x3ae   : > { %1901 = vmatpush3.msra.mxu0 %v1376_v34 }
 0x3af   : > { %1902 = vmatprep.subr.mxu0 %v2256_v14 }
 0x3b0   : > { %1903 = vmatpush3.msra.mxu0 %v1375_v36 }
 0x3b1   : > { %1904 = vmatprep.subr.mxu0 %v2256_v14 }
 0x3b2   : > { %1905 = vmatpush3.msra.mxu0 %v1374_v40 }
 0x3b3   : > { %1906 = vmatprep.subr.mxu0 %v2256_v14  ;;  %v1716_v14 = vld [vmem:[%s2845_s13] ss:$0 sm:$0xff] }
 0x3b4   : > { %1907 = vmatpush3.msra.mxu0 %v1373_v42 }
 0x44d   : > { %v1220_v45 = vpop.f32.mrf.mxu0 }
 0x44e   : > { %v1301_v47 = vrot.slane %v1220_v45, %v706_v39 }
 0x44f   : > { %v1861_v46 = vpop.f32.mrf.mxu0 }
 0x451   : > { %v1294_v48 = vpop.f32.mrf.mxu0 }
 0x452   : > { %v1302_v25 = vmul.f32 %v1301_v47, %v1294_v48 }
 0x453   : > { %v1868_v28 = vpop.f32.mrf.mxu0 }
 0x454   : > { %1909 = vmatmul.mubr.f32.vlgmr.msra.gmra.mxu0 %v1302_v25 }
 0x455   : > { %v1369_v49 = vpop.f32.mrf.mxu0 }
 0x456   : > { %1944 = vmatmul.mubr.f32.vlgmr.msra.gmra.mxu1 %v1369_v49 }
 0x457   : > { %v1875_v50 = vpop.f32.mrf.mxu0 }
 0x514   : > { %v1462_v51 = vpop.f32.mrf.mxu0 }
 0x515   : > { %v1463_v52 = vadd.f32 %v1716_v14, %v1462_v51 }
 0x516   : > { %v1910_v39 = vpop.f32.mrf.mxu0  ;;  %v1556_v53 = vpop.f32.mrf.mxu1 }
 0x517   : > { %v1466_v54 = vmax.f32 %v1463_v52, 0.0  ;;  %v1557_v55 = vadd.f32 %v1717_v38, %v1556_v53 }
 0x518   : > { %v1945_v56 = vpop.f32.mrf.mxu1 }
 0x519   : > { %v1560_v57 = vadd.f32 %v1557_v55, %v1466_v54 }
 0x51b   : > { %1561 = vst [vmem:[%s593_s17] sm:$0xff] %v1560_v57 }
 0x51c   : > { %2188 = shalt.err (!%p2185_p6)
}
 0x51d   : > { %s2189_s27 = scalar_lea.hbm %s1574_s28, 128  ;;  %s2193_s30 = scalar_lea.hbm %s2893_s26, 256 }
 0x51e   : > { %p2190_p10 = scmp.ne.s32.totalorder %s1574_s28, %s2189_s27  ;;  %p2194_p11 = scmp.lt.s32.totalorder %s1574_s28, %s2893_s26 }
 0x51f   : > { %p2195_p4 = scmp.lt.s32.totalorder %s2193_s30, %s2189_s27 }
 0x520   : > { %p2191_p8 = pnand %p2190_p10, %p2894_p9 }
 0x521   : > { %p2196_p7 = por %p2195_p4, %p2194_p11 }
 0x522   : > { %p2192_p3 = pneg %p2191_p8 }
 0x524   : > { %p2197_p12 = pnand %p2196_p7, %p2192_p3 }
 0x526   : > { %2200 = shalt.err (!%p2197_p12)
}
 0x527   : > { %1964 = dma.vmem_to_hbm [thread:$0]  (%p2894_p9), %s1577_s16, 128, %s1574_s28, %s1563_s3  }
 0x528 PF: > { %s2895_s19 = sld [smem:[#allocation16_spill]]  ;;  %p2898_p0 = scmp.ge.s32.totalorder %s2247_s24, 2 }
 0x529   : > { %s2896_s23 = sld [smem:[#allocation18_spill]] }
 0x52e   : > { %s1588_s10 = sand.u32 1, %s2895_s19  }
 0x52f   : > { %p2897_p13 = scmp.ne.s32.totalorder %s2896_s23, 0  ;;  %s1589_s11 = scalar_lea.sflag [#allocation4], %s1588_s10 }
 0x531   : > { %p1984_p5 = pnand %p2898_p0, %p2897_p13 }
 0x533   : > { %p1985_p1 = pneg %p1984_p5 }
 0x535   : > { %2230 = dma.done.wait (%p1985_p1), %s1589_s11, 128  }
 0x536   : > { %2232 = vsyncadd (%p1985_p1), %s1589_s11, 4294967168  ;;  %s2899_s25 = sld [smem:[#allocation17_spill]]  ;;  %s2901_s14 = smov %s2440_s21 }
 0x537   : > { %s2900_s23 = sld [smem:[#allocation19_spill]]  ;;  %p31_p2 = scmp.ge.s32.totalorder %s2440_s21, 4  }
 0x538   : > { %s2902_s21 = smov %s2239_s22  ;;  %s2904_s24 = smov %s2901_s14 }
 0x539   :  { %33 = sbr.rel (!%p31_p2) target bundleno = 15 (0xf), region = 147 }
 0x53c   : > { %s2903_s22 = smov %s2899_s25 }
 0x53e   :  { %1594 = vsyncpa [#allocation3], 1 }
 0x53f   :  { %1596 = vsyncpa [#allocation3 + $0x1], 1 }
 0x540   :  { %1597 = vsyncpa [#allocation6], 1 }
 0x541   :  { %1598 = vsyncpa [#allocation9], 1 }
 0x542   :  { %1599 = vsyncpa [#allocation4], 1 }
 0x543   :  { %1601 = vsyncpa [#allocation4 + $0x1], 1 }

</bundles_post_ra>
